<compile_context>
chip_gen: v5e
topology: v5e:2x2
jax: 0.10.0
libtpu: 0.0.40
codegen_flags: <defaults>
</compile_context>

<pallas_src>
import functools
import math

import jax
import jax.numpy as jnp
import numpy as np
from jax.experimental import pallas as pl
from jax.experimental.pallas import tpu as pltpu


def _label_smoothing_kernel(x_ref, tgt_ref, out_ref, *,
                            n_rows, padding_idx, confidence, smooth_val,
                            const_entropy):
    tn, V = x_ref.shape
    tgt = tgt_ref[...]                                            # (tn, 1) int32

    # Row validity: in-range rows whose target is not the padding index.
    # Out-of-range tail rows hold stale VMEM (possibly NaN/Inf), so x itself
    # must be zeroed element-wise for invalid rows, not just their weight.
    row0 = pl.program_id(0) * tn
    row_idx = row0 + jax.lax.broadcasted_iota(jnp.int32, (tn, 1), 0)
    row_valid = (row_idx < n_rows) & (tgt != padding_idx)         # (tn, 1) bool

    x = x_ref[...]                                                # (tn, V)
    xm = jnp.where(row_valid, x, 0).astype(jnp.float32)           # masked, f32

    # Per-row reductions (lane reduce -> XLU).
    bulk = jnp.sum(xm, axis=-1, keepdims=True)                    # (tn, 1)

    col = jax.lax.broadcasted_iota(jnp.int32, (1, V), 1)          # (1, V)
    tgt_x = jnp.sum(jnp.where(col == tgt, xm, 0.0),
                    axis=-1, keepdims=True)                       # (tn, 1) x[r, tgt_r]

    pad_x = xm[:, padding_idx:padding_idx + 1]                    # (tn, 1) static slice

    # sum_c td[r,c] * x[r,c] for valid rows (0 for invalid rows).
    weighted = (smooth_val * bulk
                + (confidence - smooth_val) * tgt_x
                - smooth_val * pad_x)                             # (tn, 1)

    n_ok = jnp.sum(row_valid.astype(jnp.float32))
    partial = n_ok * const_entropy - jnp.sum(weighted)

    # Lane-dense per-block partial; final reduction happens in the wrapper.
    out_ref[...] = jnp.broadcast_to(partial, out_ref.shape).astype(jnp.float32)


def _round_up(a, b):
    return (a + b - 1) // b * b


def _choose_tile_rows(n_rows, vocab, itemsize, budget_bytes=8 * 1024 * 1024):
    """Largest row tile with x-tile bytes <= budget, rounded to the dtype's
    native sublane packing (8 rows for 4-byte, 16 for 2-byte, 32 for 1-byte)."""
    mult = {4: 8, 2: 16, 1: 32}.get(int(itemsize), 8)
    tn = budget_bytes // max(1, vocab * itemsize)
    tn = max(mult, (int(tn) // mult) * mult)
    tn = min(tn, _round_up(n_rows, mult))
    return max(mult, (tn // mult) * mult)


def label_smoothing_loss(x, target, *, size, padding_idx, smoothing, tn=None):
    """Pallas equivalent of LabelSmoothing(size, padding_idx, smoothing)(x, target)."""
    N, V = x.shape
    assert V == size
    confidence = 1.0 - smoothing
    smooth_val = smoothing / (size - 2) if size > 2 else 0.0

    # Host-side constant entropy per non-padding row (0*log(0) handled here).
    const_entropy = 0.0
    if confidence > 0.0:
        const_entropy += confidence * math.log(confidence)
    if smooth_val > 0.0:
        const_entropy += (size - 2) * smooth_val * math.log(smooth_val)

    if not jnp.issubdtype(x.dtype, jnp.floating):
        x = x.astype(jnp.float32)
    itemsize = jnp.dtype(x.dtype).itemsize

    if tn is None:
        tn = _choose_tile_rows(N, V, itemsize)

    grid = pl.cdiv(N, tn)                       # no padded HBM copy of x
    tgt2d = target.reshape(N, 1).astype(jnp.int32)

    kernel = functools.partial(
        _label_smoothing_kernel,
        n_rows=int(N),
        padding_idx=int(padding_idx),
        confidence=float(confidence),
        smooth_val=float(smooth_val),
        const_entropy=float(const_entropy),
    )

    cost = pl.CostEstimate(
        flops=2 * N * V,
        transcendentals=0,
        bytes_accessed=N * V * itemsize + N * 4 + grid * 8 * 128 * 4,
    )

    partials = pl.pallas_call(
        kernel,
        out_shape=jax.ShapeDtypeStruct((grid, 8, 128), jnp.float32),
        grid_spec=pltpu.PrefetchScalarGridSpec(
            num_scalar_prefetch=0,
            grid=(grid,),
            in_specs=[
                pl.BlockSpec((tn, V), lambda i: (i, 0)),   # x tile (ragged tail ok)
                pl.BlockSpec((tn, 1), lambda i: (i, 0)),   # target tile
            ],
            out_specs=pl.BlockSpec((1, 8, 128), lambda i: (i, 0, 0)),
        ),
        compiler_params=pltpu.CompilerParams(
            dimension_semantics=("parallel",),
            vmem_limit_bytes=48 * 1024 * 1024,
        ),
        cost_estimate=cost,
    )(x, tgt2d)

    # Each block's scalar partial is replicated over its (8,128) tile; take one lane.
    return jnp.sum(partials[:, 0, 0])


def _reference_loss(x, target, *, size, padding_idx, smoothing):
    """Pure-JAX reference mirroring the PyTorch forward (direct KL form)."""
    N, V = x.shape
    confidence = 1.0 - smoothing
    smooth_val = smoothing / (size - 2)
    col = jnp.arange(V)[None, :]
    tgt = target[:, None]
    td = jnp.where(col == tgt, confidence, smooth_val)
    td = jnp.where(col == padding_idx, 0.0, td)
    td = jnp.where(tgt == padding_idx, 0.0, td)
    pos = td > 0
    return jnp.sum(jnp.where(pos, td * (jnp.log(jnp.where(pos, td, 1.0)) - x), 0.0))


if __name__ == "__main__":
    SIZE = 32            # vocab size (x.size(1) == size)
    BATCH, SEQ = 2, 7    # -> 14 token rows (exercises the ragged-tail path)
    N = BATCH * SEQ
    PADDING_IDX = 0
    SMOOTHING = 0.1

    key = jax.random.PRNGKey(0)
    k_logits, k_tgt = jax.random.split(key)

    logits = jax.random.normal(k_logits, (N, SIZE), dtype=jnp.float32)
    x = jax.nn.log_softmax(logits, axis=-1)               # log-probs, as KLDivLoss expects
    target = jax.random.randint(k_tgt, (N,), 0, SIZE, dtype=jnp.int32)
    target = target.at[3].set(PADDING_IDX)                # ensure padding rows exist
    target = target.at[11].set(PADDING_IDX)

    ref = _reference_loss(
        x, target, size=SIZE, padding_idx=PADDING_IDX, smoothing=SMOOTHING)

    # 1) default (auto) tile: single block with masked tail rows 14..15.
    loss = label_smoothing_loss(
        x, target, size=SIZE, padding_idx=PADDING_IDX, smoothing=SMOOTHING)
    loss = jax.block_until_ready(loss)
    np.testing.assert_allclose(np.asarray(loss), np.asarray(ref), rtol=1e-5, atol=1e-4)

    # 2) forced tn=8: two grid steps, ragged tail block with stale OOB rows.
    loss2 = label_smoothing_loss(
        x, target, size=SIZE, padding_idx=PADDING_IDX, smoothing=SMOOTHING, tn=8)
    loss2 = jax.block_until_ready(loss2)
    np.testing.assert_allclose(np.asarray(loss2), np.asarray(ref), rtol=1e-5, atol=1e-4)

    print("KERNEL_OK")
</pallas_src>

<mosaic_0001>
module attributes {stable_mosaic.version = 11 : i64} {
  func.func @_label_smoothing_kernel(%arg0: i32, %arg1: memref<16x32xf32, #tpu.memory_space<vmem>>, %arg2: memref<16x1xi32, #tpu.memory_space<vmem>>, %arg3: memref<1x8x128xf32, #tpu.memory_space<vmem>>) attributes {dimension_semantics = [#tpu.dimension_semantics<parallel>], iteration_bounds = array<i64: 1>, scalar_prefetch = 0 : i64, scratch_operands = 0 : i64, tpu.core_type = #tpu.core_type<tc>, window_params = [{transform_indices = @transform_0, window_bounds = array<i64: 16, 32>}, {transform_indices = @transform_1, window_bounds = array<i64: 16, 1>}, {transform_indices = @transform_2, window_bounds = array<i64: 1, 8, 128>}]} {
    %c0 = arith.constant 0 : index
    %c0_0 = arith.constant 0 : index
    %0 = vector.load %arg2[%c0, %c0_0] : memref<16x1xi32, #tpu.memory_space<vmem>>, vector<16x1xi32>
    %c16_i32 = arith.constant 16 : i32
    %1 = arith.muli %arg0, %c16_i32 : i32
    %2 = tpu.iota {dimensions = array<i32: 0>} : vector<16x1xi32>
    %3 = vector.broadcast %1 : i32 to vector<16x1xi32>
    %4 = arith.addi %3, %2 : vector<16x1xi32>
    %c14_i32 = arith.constant 14 : i32
    %5 = vector.broadcast %c14_i32 : i32 to vector<16x1xi32>
    %6 = arith.cmpi slt, %4, %5 : vector<16x1xi32>
    %c0_i32 = arith.constant 0 : i32
    %7 = vector.broadcast %c0_i32 : i32 to vector<16x1xi32>
    %8 = arith.cmpi ne, %0, %7 : vector<16x1xi32>
    %9 = arith.andi %6, %8 : vector<16x1xi1>
    %c0_1 = arith.constant 0 : index
    %c0_2 = arith.constant 0 : index
    %10 = vector.load %arg1[%c0_1, %c0_2] : memref<16x32xf32, #tpu.memory_space<vmem>>, vector<16x32xf32>
    %c0_i32_3 = arith.constant 0 : i32
    %11 = arith.sitofp %c0_i32_3 : i32 to f32
    %12 = vector.shape_cast %9 : vector<16x1xi1> to vector<16x1xi1>
    %13 = vector.broadcast %12 : vector<16x1xi1> to vector<16x32xi1>
    %14 = vector.broadcast %11 : f32 to vector<16x32xf32>
    %15 = arith.select %13, %10, %14 : vector<16x32xi1>, vector<16x32xf32>
    %cst = arith.constant dense<0.000000e+00> : vector<16xf32>
    %16 = vector.multi_reduction <add>, %15, %cst [1] : vector<16x32xf32> to vector<16xf32>
    %17 = vector.shape_cast %16 : vector<16xf32> to vector<16x1xf32>
    %18 = tpu.iota {dimensions = array<i32: 1>} : vector<1x32xi32>
    %19 = vector.broadcast %18 : vector<1x32xi32> to vector<16x32xi32>
    %20 = vector.broadcast %0 : vector<16x1xi32> to vector<16x32xi32>
    %21 = arith.cmpi eq, %19, %20 : vector<16x32xi32>
    %cst_4 = arith.constant 0.000000e+00 : f32
    %22 = vector.broadcast %cst_4 : f32 to vector<16x32xf32>
    %23 = arith.select %21, %15, %22 : vector<16x32xi1>, vector<16x32xf32>
    %cst_5 = arith.constant dense<0.000000e+00> : vector<16xf32>
    %24 = vector.multi_reduction <add>, %23, %cst_5 [1] : vector<16x32xf32> to vector<16xf32>
    %25 = vector.shape_cast %24 : vector<16xf32> to vector<16x1xf32>
    %26 = vector.extract_strided_slice %15 {offsets = [0, 0], sizes = [16, 1], strides = [1, 1]} : vector<16x32xf32> to vector<16x1xf32>
    %cst_6 = arith.constant 0.00333333341 : f32
    %27 = vector.broadcast %cst_6 : f32 to vector<16x1xf32>
    %28 = arith.mulf %27, %17 : vector<16x1xf32>
    %cst_7 = arith.constant 0.896666646 : f32
    %29 = vector.broadcast %cst_7 : f32 to vector<16x1xf32>
    %30 = arith.mulf %29, %25 : vector<16x1xf32>
    %31 = arith.addf %28, %30 : vector<16x1xf32>
    %cst_8 = arith.constant 0.00333333341 : f32
    %32 = vector.broadcast %cst_8 : f32 to vector<16x1xf32>
    %33 = arith.mulf %32, %26 : vector<16x1xf32>
    %34 = arith.subf %31, %33 : vector<16x1xf32>
    %35 = arith.extui %9 : vector<16x1xi1> to vector<16x1xi32>
    %36 = arith.sitofp %35 : vector<16x1xi32> to vector<16x1xf32>
    %37 = vector.shape_cast %36 : vector<16x1xf32> to vector<1x16x1xf32>
    %cst_9 = arith.constant dense<0.000000e+00> : vector<1xf32>
    %38 = vector.multi_reduction <add>, %37, %cst_9 [1, 2] : vector<1x16x1xf32> to vector<1xf32>
    %39 = vector.shape_cast %38 : vector<1xf32> to vector<1x1x1xf32>
    %40 = vector.extract %39[0, 0, 0] : f32 from vector<1x1x1xf32>
    %cst_10 = arith.constant -0.665202737 : f32
    %41 = arith.mulf %40, %cst_10 : f32
    %42 = vector.shape_cast %34 : vector<16x1xf32> to vector<1x16x1xf32>
    %cst_11 = arith.constant dense<0.000000e+00> : vector<1xf32>
    %43 = vector.multi_reduction <add>, %42, %cst_11 [1, 2] : vector<1x16x1xf32> to vector<1xf32>
    %44 = vector.shape_cast %43 : vector<1xf32> to vector<1x1x1xf32>
    %45 = vector.extract %44[0, 0, 0] : f32 from vector<1x1x1xf32>
    %46 = arith.subf %41, %45 : f32
    %47 = vector.broadcast %46 : f32 to vector<1x8x128xf32>
    %c0_12 = arith.constant 0 : index
    %c0_13 = arith.constant 0 : index
    %c0_14 = arith.constant 0 : index
    %48 = vector.load %arg3[%c0_12, %c0_13, %c0_14] : memref<1x8x128xf32, #tpu.memory_space<vmem>>, vector<1x8x128xf32>
    tpu.vector_store %arg3[%c0_12, %c0_13, %c0_14], %47 {strides = array<i32>} : memref<1x8x128xf32, #tpu.memory_space<vmem>>, vector<1x8x128xf32>,
    return
  }
  func.func @transform_0(%arg0: i32) -> (i32, i32) {
    %c0_i32 = arith.constant 0 : i32
    %c0_i32_0 = arith.constant 0 : i32
    return %arg0, %c0_i32 : i32, i32
  }
  func.func @transform_1(%arg0: i32) -> (i32, i32) {
    %c0_i32 = arith.constant 0 : i32
    %c0_i32_0 = arith.constant 0 : i32
    return %arg0, %c0_i32 : i32, i32
  }
  func.func @transform_2(%arg0: i32) -> (i32, i32, i32) {
    %c0_i32 = arith.constant 0 : i32
    %c0_i32_0 = arith.constant 0 : i32
    %c0_i32_1 = arith.constant 0 : i32
    return %arg0, %c0_i32, %c0_i32_0 : i32, i32, i32
  }
}

</mosaic_0001>

<bundles_post_ra>
// kernel: tpu_custom_call.1
= control target key start
LH: loop header
LB: loop body
LE: loop exit
PB: predicated region body
PF: predicated region fallthrough
CT: control target
= control target key end

     0   :  { %v15_v1 = vlaneseq  ;;  %s211_s0 = inlined_call_operand.vmem [shape: f32[14,32], index: 0, kind: input, shape index: {}]   ;;  %s212_s1 = inlined_call_operand.vmem [shape: s32[14,1], index: 1, kind: input, shape index: {}]   ;;  %s213_s2 = inlined_call_operand.hbm [shape: f32[1,8,128], index: 2, kind: output, shape index: {}]  }
   0x1   :  { %v12_v0 = vld [vmem:[%s212_s1] sm:$0xff] }
   0x2   :  { %7 = vsyncpa [#allocation3], 0  ;;  %v160_v2 = vmov 0   ;;  %vm23_vm0 = vcmp.ne.s32.totalorder %v12_v0, 0  ;;  %v13_v3 = vld [vmem:[%s212_s1 + $0x8] sm:$0xff]  ;;  %v16_v5 = vshrl.u32 %v15_v1, 7 }
   0x3   :  { %133 = vset.pattern.permute.xlu1 %v160_v2  ;;  %132 = vset.pattern.permute.xlu0 %v160_v2  ;;  %v29_v4 = vsel %vm23_vm0, 1, %v160_v2  ;;  %vm24_vm1 = vcmp.ne.s32.totalorder %v13_v3, 0  ;;  %v49_v9 = vand.u32 127, %v15_v1  ;;  %v27_v11 = vld [vmem:[%s211_s0] sm:$0xff]  ;;  %vm41_vm5 = vcmask 261120   ;;  %v28_v18 = vld [vmem:[%s211_s0 + $0x8] sm:$0xff] }
   0x4   :  { %51 = vperm.xlu1 %133, %v12_v0   ;;  %32 = vperm.xlu0 %132, %v29_v4   ;;  %v17_v6 = vadd.s32 8, %v16_v5  ;;  %v161_v24 = vmov 0.0   ;;  %vm78_vm9 = vcmask 7168   ;;  %s162_s16 = smov [#allocation2]   ;;  %s114_s21 = sshll.u32 %s213_s2, 4  ;;  %s115_s21 = int_to_ptr.hbm [resolvable:$true] %s114_s21 }
   0x5   :  { %v123_v25 = vsel %vm23_vm0, 1.0, %v161_v24  ;;  %s112_s17 = sshll.u32 %s162_s16, 4  ;;  %s113_s17 = int_to_ptr.vmem [resolvable:$true] %s112_s17 }
   0x6   :  { %vm22_vm2 = vcmp.lt.s32.totalorder %v17_v6, 14  ;;  %v79_v27 = vsel %vm78_vm9, %v123_v25, 0.0 }
   0x7   :  { %vm185_vm3 = vmand %vm22_vm2, %vm24_vm1 }
   0x8   :  { %v30_v8 = vsel %vm185_vm3, 1, %v160_v2  ;;  %v124_v26 = vsel %vm185_vm3, 1.0, %v161_v24 }
   0x9   :  { %v80_v28 = vsel %vm78_vm9, %v124_v26, 0.0 }
   0xa   :  { %v81_v29 = vadd.f32 %v80_v28, %v79_v27 }
   0xc   :  { %54 = vperm.xlu1 %133, %v13_v3   ;;  %35 = vperm.xlu0 %132, %v30_v8  }
  0x76   :  { %v52_v10 = vpop.permute.xlu1 %51  ;;  %v33_v12 = vpop.permute.xlu0 %32 }
  0x77   :  { %vm56_vm4 = vcmp.eq.s32.totalorder %v49_v9, %v52_v10  ;;  %vm37_vm6 = vcmp.eq.s32.totalorder %v33_v12, 1 }
  0x78   :  { %v39_v13 = vsel %vm37_vm6, %v27_v11, 0.0 }
  0x79   :  { %v42_v14 = vsel %vm41_vm5, %v39_v13, 0.0  ;;  %v58_v15 = vsel %vm56_vm4, %v39_v13, 0.0  ;;  %v72_v38 = vmul.f32 0.0033333334, %v39_v13 }
  0x7a   :  { %43 = vadd.xlane.f32.xlu2 %v42_v14  ;;  %v60_v16 = vsel %vm41_vm5, %v58_v15, 0.0 }
  0x7b   :  { %61 = vadd.xlane.f32.xlu0 %v60_v16 }
  0x7e   :  { %v55_v17 = vpop.permute.xlu1 %54  ;;  %v36_v19 = vpop.permute.xlu0 %35 }
  0x7f   :  { %vm38_vm7 = vcmp.eq.s32.totalorder %v36_v19, 1  ;;  %vm57_vm8 = vcmp.eq.s32.totalorder %v49_v9, %v55_v17 }
  0x80   :  { %v40_v20 = vsel %vm38_vm7, %v28_v18, 0.0 }
  0x81   :  { %v45_v21 = vsel %vm41_vm5, %v40_v20, 0.0  ;;  %v59_v22 = vsel %vm57_vm8, %v40_v20, 0.0  ;;  %v73_v40 = vmul.f32 0.0033333334, %v40_v20 }
  0x82   :  { %46 = vadd.xlane.f32.xlu2 %v45_v21  ;;  %v63_v23 = vsel %vm41_vm5, %v59_v22, 0.0 }
  0x83   :  { %64 = vadd.xlane.f32.xlu1 %v63_v23 }
  0x8a   :  { %82 = vadd.xlane.f32.xlu2 %v81_v29 }
  0xed   :  { %v44_v30 = vpop.xlane.xlu2 %43 }
  0xee   :  { %v62_v31 = vpop.xlane.xlu0 %61  ;;  %v66_v32 = vmul.f32 0.0033333334, %v44_v30 }
  0xef   :  { %v68_v33 = vmul.f32 0.89666665, %v62_v31 }
  0xf1   :  { %v70_v34 = vadd.f32 %v68_v33, %v66_v32 }
  0xf3   :  { %v74_v41 = vsub.f32 %v70_v34, %v72_v38 }
  0xf5   :  { %v47_v35 = vpop.xlane.xlu2 %46  ;;  %v92_v44 = vsel %vm78_vm9, %v74_v41, 0.0 }
  0xf6   :  { %v67_v36 = vmul.f32 0.0033333334, %v47_v35  ;;  %v65_v37 = vpop.xlane.xlu1 %64 }
  0xf7   :  { %v69_v39 = vmul.f32 0.89666665, %v65_v37 }
  0xf9   :  { %v71_v42 = vadd.f32 %v69_v39, %v67_v36 }
  0xfb   :  { %v75_v43 = vsub.f32 %v71_v42, %v73_v40 }
  0xfd   :  { %v93_v45 = vsel %vm78_vm9, %v75_v43, 0.0  ;;  %v83_v47 = vpop.xlane.xlu2 %82 }
  0xfe   :  { %v94_v46 = vadd.f32 %v93_v45, %v92_v44  ;;  %v84_v48 = vrot.slane %v83_v47, 4 }
 0x100   :  { %95 = vadd.xlane.f32.xlu2 %v94_v46  ;;  %v85_v49 = vadd.f32 %v84_v48, %v83_v47 }
 0x102   :  { %v86_v50 = vrot.slane %v85_v49, 2 }
 0x104   :  { %v87_v51 = vadd.f32 %v86_v50, %v85_v49 }
 0x106   :  { %v88_v52 = vrot.slane %v87_v51, 1 }
 0x108   :  { %v89_v53 = vadd.f32 %v88_v52, %v87_v51 }
 0x10a   :  { %125 = vpush %v89_v53 }
 0x13b   :  { %s126_s0 = spop %125 }
 0x13c   :  { %s91_s18 = smul.f32 -0.66520274, %s126_s0 }
 0x173   :  { %v96_v54 = vpop.xlane.xlu2 %95 }
 0x174   :  { %v97_v55 = vrot.slane %v96_v54, 4 }
 0x176   :  { %v98_v56 = vadd.f32 %v97_v55, %v96_v54 }
 0x178   :  { %v99_v57 = vrot.slane %v98_v56, 2 }
 0x17a   :  { %v100_v58 = vadd.f32 %v99_v57, %v98_v56 }
 0x17c   :  { %v101_v59 = vrot.slane %v100_v58, 1 }
 0x17e   :  { %v102_v60 = vadd.f32 %v101_v59, %v100_v58 }
 0x180   :  { %127 = vpush %v102_v60 }
 0x1b1   :  { %s128_s22 = spop %127 }
 0x1b2   :  { %s104_s23 = ssub.f32 %s91_s18, %s128_s22 }
 0x1b4   :  { %v105_v61 = vstv %s104_s23 }
 0x1b5   :  { %106 = vst [vmem:[#allocation2] sm:$0xff] %v105_v61 }
 0x1b6   :  { %117 = dma.vmem_to_hbm [thread:$0]  %s113_s17, 128, %s115_s21, [#allocation3]  }
 0x1b7   :  { %158 = dma.done.wait [#allocation3], 128  }
 0x1b8   :  { %159 = vsyncadd [#allocation3], 4294967168 }
 0x1b9   :  { %122 = vsyncpa [#allocation3], 1 }

</bundles_post_ra>
